<compile_context>
chip_gen: v7x
topology: tpu7x:2x2x1
jax: 0.10.0
libtpu: 0.0.40
codegen_flags: <defaults>
</compile_context>

<pallas_src>
import functools

import jax
import jax.numpy as jnp
from jax.experimental import pallas as pl
from jax.experimental.pallas import tpu as pltpu

_MIB = 1024 * 1024


def _round_up(a: int, b: int) -> int:
    return (a + b - 1) // b * b


def _tpu_arch_params():
    """Per-generation tuning: (vmem_limit_bytes, mxu_align, multi_tensorcore).

    Falls back to conservative, known-good settings (48 MiB scoped VMEM,
    128-alignment, single core) when the generation can't be determined.
    """
    kind = ""
    try:
        kind = jax.devices()[0].device_kind.lower()
    except Exception:
        pass
    vmem_cap = None
    try:
        vmem_cap = int(pltpu.get_tpu_info().vmem_capacity_bytes)
    except Exception:
        pass

    vmem_limit, align, multi_tc = 48 * _MIB, 128, False
    if "v7" in kind:                                    # 64 MiB VMEM, 2 TCs, 256x256 MXU
        vmem_limit, align, multi_tc = 56 * _MIB, 256, True
    elif "v6" in kind:                                  # 128 MiB VMEM, 1 TC, 256x256 MXU
        vmem_limit, align, multi_tc = 96 * _MIB, 256, False
    elif "v5 lite" in kind or "v5e" in kind or "v5lite" in kind:
        vmem_limit, align, multi_tc = 96 * _MIB, 128, False   # 128 MiB, 1 TC, 128x128 MXU
    elif "v5" in kind or "v4" in kind:                  # v5p / v4 megacore (2 TCs)
        vmem_limit, align, multi_tc = 96 * _MIB, 128, True
    if vmem_cap is not None:
        # Never ask for more than ~85% of what the chip physically has.
        vmem_limit = min(vmem_limit, max(32 * _MIB, int(vmem_cap * 0.85)))
    return vmem_limit, align, multi_tc


def _pick_ff_tile(Fp: int, align: int, cap: int) -> int:
    """Largest multiple of `align` that divides Fp and is <= cap (>= align)."""
    best = align
    cap = max(align, min(cap, Fp))
    t = align
    while t <= cap:
        if Fp % t == 0:
            best = t
        t += align
    return best


def _ffn_resident_kernel(x_ref, wi_ref, wo_ref, o_ref, acc_ref, *, tk, n_steps):
    """grid = (row tiles,).  Both weight matrices are VMEM-resident (constant
    index_map -> fetched from HBM once); the d_ff reduction runs as an in-kernel
    loop over tk-wide slices of the resident weight refs with an f32 accumulator."""
    x = x_ref[...]
    if n_steps == 1:
        h = jnp.maximum(
            jnp.dot(x, wi_ref[...], preferred_element_type=jnp.float32), 0.0)
        # TODO(synk): training-mode dropout would mask `h` here via
        # pltpu.prng_random_bits; eval mode is the identity (nn.Dropout.eval()).
        o_ref[...] = jnp.dot(h.astype(wo_ref.dtype), wo_ref[...],
                             preferred_element_type=jnp.float32).astype(o_ref.dtype)
    else:
        acc_ref[...] = jnp.zeros_like(acc_ref)

        def body(kf, carry):
            f0 = pl.multiple_of(kf * tk, tk)
            wi_c = wi_ref[:, pl.ds(f0, tk)]
            wo_c = wo_ref[pl.ds(f0, tk), :]
            h = jnp.maximum(
                jnp.dot(x, wi_c, preferred_element_type=jnp.float32), 0.0)
            acc_ref[...] += jnp.dot(h.astype(wo_c.dtype), wo_c,
                                    preferred_element_type=jnp.float32)
            return carry

        jax.lax.fori_loop(0, n_steps, body, 0, unroll=n_steps <= 8)
        o_ref[...] = acc_ref[...].astype(o_ref.dtype)


def _ffn_streamed_kernel(x_ref, wi_ref, wo_ref, o_ref, acc_ref):
    """grid = (row tiles, d_ff tiles).  d_ff is the reduction axis of the second
    matmul: partial results accumulate into an f32 VMEM scratch and the output
    tile is stored only on the final d_ff step."""
    kf = pl.program_id(1)

    @pl.when(kf == 0)
    def _init():
        acc_ref[...] = jnp.zeros_like(acc_ref)

    h = jnp.dot(x_ref[...], wi_ref[...], preferred_element_type=jnp.float32)
    h = jnp.maximum(h, 0.0)
    # TODO(synk): training-mode dropout would mask `h` here; eval mode is identity.
    acc_ref[...] += jnp.dot(h.astype(wo_ref.dtype), wo_ref[...],
                            preferred_element_type=jnp.float32)

    @pl.when(kf == pl.num_programs(1) - 1)
    def _finalize():
        o_ref[...] = acc_ref[...].astype(o_ref.dtype)


def transformer_dense_relu_dense(x, wi_t, wo_t, *, tm=None, tk_ff=2048,
                                 vmem_limit_bytes=None):
    """x: (..., d_model); wi_t: (d_model, d_ff); wo_t: (d_ff, d_model).

    wi_t / wo_t are the transposed nn.Linear weights, i.e. the math is
    relu(x @ wi_t) @ wo_t, identical to wo(relu(wi(x))) in PyTorch (bias=False).
    """
    orig_shape = x.shape
    d_model = orig_shape[-1]
    d_ff = wi_t.shape[1]
    assert wi_t.shape == (d_model, d_ff)
    assert wo_t.shape == (d_ff, d_model)

    x2 = x.reshape(-1, d_model)
    N = x2.shape[0]

    vmem_auto, align, multi_tc = _tpu_arch_params()
    if vmem_limit_bytes is None:
        vmem_limit_bytes = vmem_auto
    budget = int(vmem_limit_bytes * 0.75)   # headroom for Mosaic internal scratch

    xbytes = jnp.dtype(x.dtype).itemsize
    wibytes = jnp.dtype(wi_t.dtype).itemsize
    wobytes = jnp.dtype(wo_t.dtype).itemsize
    obytes = xbytes

    # Feature dims padded to the MXU pass width (256 on v6e/v7x, 128 on v5e):
    # unmasked lane-dense stores and fully-filled MXU passes for odd sizes.
    Dp = _round_up(d_model, align)
    Fp = _round_up(d_ff, align)

    # Weights-resident fast path: both padded weight matrices live in VMEM and
    # are DMA'd from HBM exactly once (constant index_map).  The 2x factor is a
    # safe allowance for the pipeline's buffer allocation.
    weight_vmem = 2 * (Dp * Fp * wibytes + Fp * Dp * wobytes)
    resident = weight_vmem <= vmem_limit_bytes // 2

    # Row tile: big enough to amortize per-grid-step overhead (and, for the
    # streamed path, weight re-streaming), never larger than the row count.
    row_align = 16 if x.dtype == jnp.bfloat16 else 8
    if tm is None:
        tm = 512 if resident else 1024
    tm = max(row_align, min(_round_up(tm, row_align), _round_up(N, row_align)))
    # Multi-TensorCore chips (v7x / v4 / v5p): keep >= 2 row blocks whenever N
    # allows so the "parallel" row axis actually shards across both cores.
    if multi_tc and N > row_align:
        tm = min(tm, _round_up(-(-N // 2), row_align))

    if resident:
        tk = _pick_ff_tile(Fp, align, min(tk_ff, Fp))

        def vmem_estimate(tm_, tk_):
            return (weight_vmem                      # resident wi + wo
                    + 2 * tm_ * Dp * xbytes          # x tile (double-buffered)
                    + 2 * tm_ * Dp * obytes          # out tile (double-buffered)
                    + tm_ * Dp * 4                   # f32 accumulator
                    + tm_ * tk_ * (4 + wobytes))     # h (f32) + cast copy

        # tk only sizes the in-kernel intermediate (weights stay resident), so
        # shrink it first; only then shrink the row tile.
        while vmem_estimate(tm, tk) > budget and tk > align:
            tk = _pick_ff_tile(Fp, align, tk // 2)
        while vmem_estimate(tm, tk) > budget and tm > row_align:
            new_tm = max(row_align, ((tm // 2) // row_align) * row_align)
            if new_tm == tm:
                break
            tm = new_tm
    else:
        tk = _pick_ff_tile(Fp, align, tk_ff)

        def vmem_estimate(tm_, tk_):
            return (2 * tm_ * Dp * xbytes            # x tile
                    + 2 * tm_ * Dp * obytes          # out tile
                    + 2 * Dp * tk_ * wibytes         # wi chunk (double-buffered)
                    + 2 * tk_ * Dp * wobytes         # wo chunk (double-buffered)
                    + tm_ * Dp * 4                   # f32 accumulator
                    + tm_ * tk_ * (4 + wobytes))     # h (f32) + cast copy

        while vmem_estimate(tm, tk) > budget:
            if tk > align and (tk >= tm or tm <= row_align):
                tk = _pick_ff_tile(Fp, align, tk // 2)
            elif tm > row_align:
                tm = max(row_align, ((tm // 2) // row_align) * row_align)
            else:
                break

    Np = _round_up(N, tm)

    # Zero-padding is exact: padded d_model rows of wi_t contribute 0, padded
    # d_ff columns give relu(0)=0 and contribute 0 to the second matmul, and
    # padded output rows/columns are sliced off below.
    # TODO(synk): in a real model, pad the weights once at parameter-init time
    # rather than on every forward call.
    x_p = x2 if (Np, Dp) == (N, d_model) else jnp.pad(
        x2, ((0, Np - N), (0, Dp - d_model)))
    wi_p = wi_t if (Dp, Fp) == (d_model, d_ff) else jnp.pad(
        wi_t, ((0, Dp - d_model), (0, Fp - d_ff)))
    wo_p = wo_t if (Fp, Dp) == (d_ff, d_model) else jnp.pad(
        wo_t, ((0, Fp - d_ff), (0, Dp - d_model)))

    flops = 4 * Np * Dp * Fp
    if resident:
        kernel = functools.partial(_ffn_resident_kernel, tk=tk, n_steps=Fp // tk)
        grid = (Np // tm,)
        in_specs = [
            pl.BlockSpec((tm, Dp), lambda i: (i, 0)),     # x rows
            pl.BlockSpec((Dp, Fp), lambda i: (0, 0)),     # full wi (resident)
            pl.BlockSpec((Fp, Dp), lambda i: (0, 0)),     # full wo (resident)
        ]
        out_spec = pl.BlockSpec((tm, Dp), lambda i: (i, 0))
        dims = ("parallel",)
        bytes_accessed = (Np * Dp * (xbytes + obytes)
                          + Dp * Fp * wibytes + Fp * Dp * wobytes)
    else:
        kernel = _ffn_streamed_kernel
        grid = (Np // tm, Fp // tk)
        in_specs = [
            pl.BlockSpec((tm, Dp), lambda i, kf: (i, 0)),    # x rows
            pl.BlockSpec((Dp, tk), lambda i, kf: (0, kf)),   # wi chunk
            pl.BlockSpec((tk, Dp), lambda i, kf: (kf, 0)),   # wo chunk
        ]
        out_spec = pl.BlockSpec((tm, Dp), lambda i, kf: (i, 0))
        dims = ("parallel", "arbitrary")
        bytes_accessed = (Np * Dp * (xbytes + obytes)
                          + (Np // tm) * (Dp * Fp * wibytes + Fp * Dp * wobytes))

    out = pl.pallas_call(
        kernel,
        out_shape=jax.ShapeDtypeStruct((Np, Dp), x.dtype),
        grid_spec=pltpu.PrefetchScalarGridSpec(
            num_scalar_prefetch=0,
            grid=grid,
            in_specs=in_specs,
            out_specs=out_spec,
            scratch_shapes=[pltpu.VMEM((tm, Dp), jnp.float32)],
        ),
        compiler_params=pltpu.CompilerParams(
            dimension_semantics=dims,
            vmem_limit_bytes=vmem_limit_bytes,
        ),
        cost_estimate=pl.CostEstimate(flops=flops, transcendentals=0,
                                      bytes_accessed=bytes_accessed),
    )(x_p, wi_p, wo_p)

    if (Np, Dp) != (N, d_model):
        out = out[:N, :d_model]
    return out.reshape(orig_shape)


def reference(x, wi_t, wo_t):
    h = jnp.maximum(jnp.dot(x, wi_t, precision=jax.lax.Precision.HIGHEST), 0.0)
    return jnp.dot(h, wo_t, precision=jax.lax.Precision.HIGHEST)


if __name__ == "__main__":
    # Config: d_model=32, d_ff=64, B=2, S=8, dropout in eval mode (identity).
    B, S, d_model, d_ff = 2, 8, 32, 64
    FACTOR = 1.0

    key = jax.random.PRNGKey(0)
    kx, kwi, kwo, kwi2, kwo2, kwi3, kwo3 = jax.random.split(key, 7)

    x = jax.random.normal(kx, (B, S, d_model), dtype=jnp.float32)

    # nn.Linear weights are (out, in) and the math is x @ W.T, so build the
    # transposed forms directly.  Init matches reset_parameters():
    # normal(0, FACTOR * d_model**-0.5) / normal(0, FACTOR * d_ff**-0.5).
    wi_t = (jax.random.normal(kwi, (d_model, d_ff), dtype=jnp.float32)
            * (FACTOR * d_model ** -0.5))
    wo_t = (jax.random.normal(kwo, (d_ff, d_model), dtype=jnp.float32)
            * (FACTOR * d_ff ** -0.5))

    # 1) f32, weights-resident single-step path.
    out = jax.block_until_ready(transformer_dense_relu_dense(x, wi_t, wo_t))
    ref = reference(x, wi_t, wo_t)
    assert out.shape == (B, S, d_model)
    assert jnp.allclose(out, ref, atol=1e-4, rtol=1e-4), "f32 mismatch vs reference"

    # 2) bf16 MXU fast path (f32 accumulation inside the kernel).
    xb, wib, wob = (a.astype(jnp.bfloat16) for a in (x, wi_t, wo_t))
    out_bf16 = jax.block_until_ready(transformer_dense_relu_dense(xb, wib, wob))
    ref_bf16 = reference(xb.astype(jnp.float32), wib.astype(jnp.float32),
                         wob.astype(jnp.float32))
    assert out_bf16.dtype == jnp.bfloat16
    assert jnp.allclose(out_bf16.astype(jnp.float32), ref_bf16,
                        atol=7.5e-2, rtol=7.5e-2), "bf16 mismatch vs reference"

    # 3) Weights-resident path with an in-kernel d_ff loop (n_steps > 1).
    d_ff_big = 512
    wi2 = (jax.random.normal(kwi2, (d_model, d_ff_big), dtype=jnp.float32)
           * (FACTOR * d_model ** -0.5))
    wo2 = (jax.random.normal(kwo2, (d_ff_big, d_model), dtype=jnp.float32)
           * (FACTOR * d_ff_big ** -0.5))
    out2 = jax.block_until_ready(
        transformer_dense_relu_dense(x, wi2, wo2, tk_ff=128))
    ref2 = reference(x, wi2, wo2)
    assert jnp.allclose(out2, ref2, atol=2e-3, rtol=2e-3), "resident-loop mismatch"

    # 4) Streamed fallback path (weights forced out of the resident budget).
    d_ff_huge = 2048
    wi3 = (jax.random.normal(kwi3, (d_model, d_ff_huge), dtype=jnp.float32)
           * (FACTOR * d_model ** -0.5))
    wo3 = (jax.random.normal(kwo3, (d_ff_huge, d_model), dtype=jnp.float32)
           * (FACTOR * d_ff_huge ** -0.5))
    out3 = jax.block_until_ready(
        transformer_dense_relu_dense(x, wi3, wo3, vmem_limit_bytes=4 * _MIB))
    ref3 = reference(x, wi3, wo3)
    assert jnp.allclose(out3, ref3, atol=2e-3, rtol=2e-3), "streamed-path mismatch"

    print("KERNEL_OK")
</pallas_src>

<mosaic_0001>
module attributes {stable_mosaic.version = 11 : i64} {
  func.func @_ffn_resident_kernel(%arg0: i32, %arg1: memref<16x128xf32, #tpu.memory_space<vmem>>, %arg2: memref<128x128xf32, #tpu.memory_space<vmem>>, %arg3: memref<128x128xf32, #tpu.memory_space<vmem>>, %arg4: memref<16x128xf32, #tpu.memory_space<vmem>>, %arg5: memref<16x128xf32, #tpu.memory_space<vmem>>) attributes {dimension_semantics = [#tpu.dimension_semantics<parallel>], iteration_bounds = array<i64: 1>, scalar_prefetch = 0 : i64, scratch_operands = 1 : i64, tpu.core_type = #tpu.core_type<tc>, window_params = [{transform_indices = @transform_0, window_bounds = array<i64: 16, 128>}, {pipeline_mode = #tpu.pipeline_mode<synchronous>, transform_indices = @transform_1, window_bounds = array<i64: 128, 128>}, {pipeline_mode = #tpu.pipeline_mode<synchronous>, transform_indices = @transform_2, window_bounds = array<i64: 128, 128>}, {transform_indices = @transform_3, window_bounds = array<i64: 16, 128>}]} {
    %c0 = arith.constant 0 : index
    %c0_0 = arith.constant 0 : index
    %0 = vector.load %arg1[%c0, %c0_0] : memref<16x128xf32, #tpu.memory_space<vmem>>, vector<16x128xf32>
    %c0_1 = arith.constant 0 : index
    %c0_2 = arith.constant 0 : index
    %1 = vector.load %arg2[%c0_1, %c0_2] : memref<128x128xf32, #tpu.memory_space<vmem>>, vector<128x128xf32>
    %cst = arith.constant dense<0.000000e+00> : vector<16x128xf32>
    %2 = tpu.matmul %0, %1, %cst {dimension_numbers = #tpu.dot_dimension_numbers<[1], [0], [0], [1], [0, 0, 1, 1], [], []>} : vector<16x128xf32>, vector<128x128xf32>, vector<16x128xf32> -> vector<16x128xf32>
    %cst_3 = arith.constant 0.000000e+00 : f32
    %3 = vector.broadcast %cst_3 : f32 to vector<16x128xf32>
    %4 = arith.maximumf %2, %3 : vector<16x128xf32>
    %c0_4 = arith.constant 0 : index
    %c0_5 = arith.constant 0 : index
    %5 = vector.load %arg3[%c0_4, %c0_5] : memref<128x128xf32, #tpu.memory_space<vmem>>, vector<128x128xf32>
    %cst_6 = arith.constant dense<0.000000e+00> : vector<16x128xf32>
    %6 = tpu.matmul %4, %5, %cst_6 {dimension_numbers = #tpu.dot_dimension_numbers<[1], [0], [0], [1], [0, 0, 1, 1], [], []>} : vector<16x128xf32>, vector<128x128xf32>, vector<16x128xf32> -> vector<16x128xf32>
    %c0_7 = arith.constant 0 : index
    %c0_8 = arith.constant 0 : index
    %7 = vector.load %arg4[%c0_7, %c0_8] : memref<16x128xf32, #tpu.memory_space<vmem>>, vector<16x128xf32>
    tpu.vector_store %arg4[%c0_7, %c0_8], %6 {strides = array<i32>} : memref<16x128xf32, #tpu.memory_space<vmem>>, vector<16x128xf32>,
    return
  }
  func.func @transform_0(%arg0: i32) -> (i32, i32) {
    %c0_i32 = arith.constant 0 : i32
    %c0_i32_0 = arith.constant 0 : i32
    return %arg0, %c0_i32 : i32, i32
  }
  func.func @transform_1(%arg0: i32) -> (i32, i32) {
    %c0_i32 = arith.constant 0 : i32
    %c0_i32_0 = arith.constant 0 : i32
    %c0_i32_1 = arith.constant 0 : i32
    return %c0_i32, %c0_i32_0 : i32, i32
  }
  func.func @transform_2(%arg0: i32) -> (i32, i32) {
    %c0_i32 = arith.constant 0 : i32
    %c0_i32_0 = arith.constant 0 : i32
    %c0_i32_1 = arith.constant 0 : i32
    return %c0_i32, %c0_i32_0 : i32, i32
  }
  func.func @transform_3(%arg0: i32) -> (i32, i32) {
    %c0_i32 = arith.constant 0 : i32
    %c0_i32_0 = arith.constant 0 : i32
    return %arg0, %c0_i32 : i32, i32
  }
}

</mosaic_0001>

<bundles_post_ra>
// kernel: tpu_custom_call.1
= control target key start
LH: loop header
LB: loop body
LE: loop exit
PB: predicated region body
PF: predicated region fallthrough
CT: control target
= control target key end

     0   :  { %8 = vsyncpa [#allocation4], 0  ;;  %s625_s0 = inlined_call_operand.hbm [shape: f32[16,128], index: 0, kind: input, shape index: {}]   ;;  %s626_s1 = inlined_call_operand.hbm [shape: f32[128,128], index: 1, kind: input, shape index: {}]   ;;  %s627_s2 = inlined_call_operand.hbm [shape: f32[128,128], index: 2, kind: input, shape index: {}]   ;;  %s628_s3 = inlined_call_operand.hbm [shape: f32[16,128], index: 3, kind: output, shape index: {}]  }
   0x1   :  { %9 = vsyncpa [#allocation7], 0 }
   0x2   :  { %10 = vsyncpa [#allocation5], 0  ;;  %s532_s12 = smov [#allocation6]   ;;  %s533_s14 = smov [#allocation3]  }
   0x3   :  { %s28_s13 = sshll.u32 %s532_s12, 4  ;;  %s16_s15 = sshll.u32 %s533_s14, 4  ;;  %s29_s13 = int_to_ptr.vmem [resolvable:$true] %s28_s13  ;;  %s558_s15 = int_to_ptr.vmem [resolvable:$true] %s16_s15 }
   0x4   :  { %s438_s18 = scalar_lea.hbm %s626_s1, 2048 }
   0x5   :  { %p439_p0 = scmp.ne.s32.totalorder %s626_s1, %s438_s18  ;;  %p442_p1 = scmp.lt.u32.totalorder %s438_s18, %s626_s1 }
   0x7   :  { %p444_p2 = pnand %p442_p1, %p439_p0 }
   0x9   :  { %447 = shalt.err (!%p444_p2)
}
   0xa   :  { %s448_s23 = scalar_lea.vmem %s29_s13, 2048  ;;  %p453_p4 = scmp.lt.s32.totalorder %s29_s13, %s29_s13 }
   0xb   :  { %p449_p3 = scmp.ne.s32.totalorder %s29_s13, %s448_s23  ;;  %p454_p5 = scmp.lt.s32.totalorder %s448_s23, %s448_s23 }
   0xd   :  { %p455_p6 = por %p454_p5, %p453_p4 }
   0xf   :  { %p456_p7 = pnand %p455_p6, %p449_p3 }
  0x11   :  { %459 = shalt.err (!%p456_p7)
}
  0x12   :  { %s534_s24 = smov 128   ;;  %s535_s25 = smov 8  }
  0x13   :  { %34 = dma.hbm_to_vmem [thread:$0]  %s626_s1, 2048, %s29_s13, [#allocation7], %s534_s24, %s534_s24, %s535_s25  }
  0x14   :  { %s460_s30 = scalar_lea.hbm %s625_s0, 256 }
  0x15   :  { %p461_p8 = scmp.ne.s32.totalorder %s625_s0, %s460_s30  ;;  %p464_p9 = scmp.lt.u32.totalorder %s460_s30, %s625_s0 }
  0x17   :  { %p466_p10 = pnand %p464_p9, %p461_p8 }
  0x19   :  { %469 = shalt.err (!%p466_p10)
}
  0x1a   :  { %s470_s8 = scalar_lea.vmem %s558_s15, 256  ;;  %p475_p12 = scmp.lt.s32.totalorder %s558_s15, %s558_s15 }
  0x1b   :  { %p471_p11 = scmp.ne.s32.totalorder %s558_s15, %s470_s8  ;;  %p476_p13 = scmp.lt.s32.totalorder %s470_s8, %s470_s8 }
  0x1d   :  { %p477_p0 = por %p476_p13, %p475_p12 }
  0x1f   :  { %p478_p1 = pnand %p477_p0, %p471_p11 }
  0x21   :  { %481 = shalt.err (!%p478_p1)
}
  0x22   :  { %22 = dma.hbm_to_vmem [thread:$0]  %s625_s0, 256, %s558_s15, [#allocation4], %s534_s24, %s534_s24, %s535_s25  }
  0x23   :  { %s536_s10 = smov [#allocation8]   ;;  %s482_s14 = scalar_lea.hbm %s627_s2, 2048 }
  0x24   :  { %s40_s11 = sshll.u32 %s536_s10, 4  ;;  %p483_p2 = scmp.ne.s32.totalorder %s627_s2, %s482_s14  ;;  %s41_s11 = int_to_ptr.vmem [resolvable:$true] %s40_s11 }
  0x25   :  { %p486_p3 = scmp.lt.u32.totalorder %s482_s14, %s627_s2 }
  0x27   :  { %p488_p4 = pnand %p486_p3, %p483_p2 }
  0x29   :  { %491 = shalt.err (!%p488_p4)
}
  0x2a   :  { %s492_s20 = scalar_lea.vmem %s41_s11, 2048  ;;  %p497_p6 = scmp.lt.s32.totalorder %s41_s11, %s41_s11 }
  0x2b   :  { %p493_p5 = scmp.ne.s32.totalorder %s41_s11, %s492_s20  ;;  %p498_p7 = scmp.lt.s32.totalorder %s492_s20, %s492_s20 }
  0x2d   :  { %p499_p8 = por %p498_p7, %p497_p6 }
  0x2f   :  { %p500_p9 = pnand %p499_p8, %p493_p5 }
  0x31   :  { %503 = shalt.err (!%p500_p9)
}
  0x32   :  { %46 = dma.hbm_to_vmem [thread:$0]  %s627_s2, 2048, %s41_s11, [#allocation7], %s534_s24, %s534_s24, %s535_s25  }
  0x33   :  { %526 = dma.done.wait [#allocation4], 256  }
  0x34   :  { %527 = vsyncadd [#allocation4], 4294967040 }
  0x35   :  { %528 = dma.done.wait [#allocation7], 4096  }
  0x36   :  { %529 = vsyncadd [#allocation7], 4294963200  ;;  %v58_v0 = vld [vmem:[#allocation6] sm:$0xff]  ;;  %v59_v1 = vld [vmem:[#allocation6 + $0x8] sm:$0xff]  ;;  %s537_s2 = smov [#allocation9]  }
  0x37   :  { %v60_v2 = vld [vmem:[#allocation6 + $0x10] sm:$0xff]  ;;  %v368_v3 = vpack.c.bf16 %v59_v1, %v58_v0  ;;  %v61_v4 = vld [vmem:[#allocation6 + $0x18] sm:$0xff]  ;;  %v62_v6 = vld [vmem:[#allocation6 + $0x20] sm:$0xff]  ;;  %s249_s21 = sshll.u32 %s537_s2, 4  ;;  %s250_s21 = int_to_ptr.vmem [resolvable:$true] %s249_s21 }
  0x38   :  { %v372_v5 = vpack.c.bf16 %v61_v4, %v60_v2  ;;  %v63_v7 = vld [vmem:[#allocation6 + $0x28] sm:$0xff]  ;;  %v64_v9 = vld [vmem:[#allocation6 + $0x30] sm:$0xff]  ;;  %v65_v10 = vld [vmem:[#allocation6 + $0x38] sm:$0xff]  ;;  %s504_s22 = scalar_lea.vmem %s250_s21, 256  ;;  %p509_p11 = scmp.lt.s32.totalorder %s250_s21, %s250_s21 }
  0x39   :  { %369 = vmatprep.subr.bf16.mxu0 %v368_v3  ;;  %v376_v8 = vpack.c.bf16 %v63_v7, %v62_v6  ;;  %v56_v11 = vld [vmem:[#allocation3] sm:$0xff]  ;;  %v151_v12 = vld [vmem:[#allocation8] sm:$0xff]  ;;  %v152_v13 = vld [vmem:[#allocation8 + $0x8] sm:$0xff]  ;;  %v380_v20 = vpack.c.bf16 %v65_v10, %v64_v9  ;;  %p505_p10 = scmp.ne.s32.totalorder %s250_s21, %s504_s22  ;;  %p510_p12 = scmp.lt.s32.totalorder %s504_s22, %s504_s22 }
  0x3a   :  { %371 = vmatpush3.bf16.msra.mxu0 %v368_v3  ;;  %330 = vmatprep.mubr.f32.mxu0 %v56_v11  ;;  %v153_v14 = vld [vmem:[#allocation8 + $0x10] sm:$0xff]  ;;  %v400_v15 = vpack.c.bf16 %v152_v13, %v151_v12  ;;  %v154_v16 = vld [vmem:[#allocation8 + $0x18] sm:$0xff]  ;;  %v155_v18 = vld [vmem:[#allocation8 + $0x20] sm:$0xff] }
  0x3b   :  { %373 = vmatprep.subr.bf16.mxu0 %v372_v5  ;;  %v404_v17 = vpack.c.bf16 %v154_v16, %v153_v14  ;;  %v156_v19 = vld [vmem:[#allocation8 + $0x28] sm:$0xff]  ;;  %v66_v21 = vld [vmem:[#allocation6 + $0x40] sm:$0xff]  ;;  %v157_v24 = vld [vmem:[#allocation8 + $0x30] sm:$0xff]  ;;  %p511_p13 = por %p510_p12, %p509_p11 }
  0x3c   :  { %401 = vmatprep.subr.bf16.mxu1 %v400_v15  ;;  %v67_v22 = vld [vmem:[#allocation6 + $0x48] sm:$0xff]  ;;  %v408_v23 = vpack.c.bf16 %v156_v19, %v155_v18  ;;  %v158_v25 = vld [vmem:[#allocation8 + $0x38] sm:$0xff]  ;;  %v68_v27 = vld [vmem:[#allocation6 + $0x50] sm:$0xff] }
  0x3d   :  { %403 = vmatpush3.bf16.msra.mxu1 %v400_v15  ;;  %v384_v26 = vpack.c.bf16 %v67_v22, %v66_v21  ;;  %v69_v28 = vld [vmem:[#allocation6 + $0x58] sm:$0xff]  ;;  %v412_v29 = vpack.c.bf16 %v158_v25, %v157_v24  ;;  %v159_v30 = vld [vmem:[#allocation8 + $0x40] sm:$0xff]  ;;  %v160_v31 = vld [vmem:[#allocation8 + $0x48] sm:$0xff]  ;;  %p512_p0 = pnand %p511_p13, %p505_p10 }
  0x3e   :  { %375 = vmatpush3.bf16.msra.mxu0 %v372_v5  ;;  %405 = vmatprep.subr.bf16.mxu1 %v404_v17  ;;  %v388_v32 = vpack.c.bf16 %v69_v28, %v68_v27  ;;  %v70_v33 = vld [vmem:[#allocation6 + $0x60] sm:$0xff]  ;;  %v71_v34 = vld [vmem:[#allocation6 + $0x68] sm:$0xff]  ;;  %v416_v35 = vpack.c.bf16 %v160_v31, %v159_v30  ;;  %v161_v36 = vld [vmem:[#allocation8 + $0x50] sm:$0xff] }
  0x3f   :  { %377 = vmatprep.subr.bf16.mxu0 %v376_v8  ;;  %v162_v37 = vld [vmem:[#allocation8 + $0x58] sm:$0xff]  ;;  %v392_v38 = vpack.c.bf16 %v71_v34, %v70_v33  ;;  %v72_v39 = vld [vmem:[#allocation6 + $0x70] sm:$0xff]  ;;  %v163_v42 = vld [vmem:[#allocation8 + $0x60] sm:$0xff] }
  0x40   :  { %v73_v40 = vld [vmem:[#allocation6 + $0x78] sm:$0xff]  ;;  %v420_v41 = vpack.c.bf16 %v162_v37, %v161_v36  ;;  %v164_v43 = vld [vmem:[#allocation8 + $0x68] sm:$0xff]  ;;  %v165_v47 = vld [vmem:[#allocation8 + $0x70] sm:$0xff] }
  0x41   :  { %407 = vmatpush3.bf16.msra.mxu1 %v404_v17  ;;  %v396_v44 = vpack.c.bf16 %v73_v40, %v72_v39  ;;  %v424_v45 = vpack.c.bf16 %v164_v43, %v163_v42  ;;  %v57_v46 = vld [vmem:[#allocation3 + $0x8] sm:$0xff] }
  0x42   :  { %379 = vmatpush3.bf16.msra.mxu0 %v376_v8  ;;  %409 = vmatprep.subr.bf16.mxu1 %v408_v23  ;;  %v166_v48 = vld [vmem:[#allocation8 + $0x78] sm:$0xff] }
  0x43   :  { %381 = vmatprep.subr.bf16.mxu0 %v380_v20  ;;  %v428_v49 = vpack.c.bf16 %v166_v48, %v165_v47 }
  0x45   :  { %411 = vmatpush3.bf16.msra.mxu1 %v408_v23 }
  0x46   :  { %383 = vmatpush3.bf16.msra.mxu0 %v380_v20  ;;  %413 = vmatprep.subr.bf16.mxu1 %v412_v29 }
  0x47   :  { %385 = vmatprep.subr.bf16.mxu0 %v384_v26 }
  0x49   :  { %415 = vmatpush3.bf16.msra.mxu1 %v412_v29 }
  0x4a   :  { %387 = vmatpush3.bf16.msra.mxu0 %v384_v26  ;;  %417 = vmatprep.subr.bf16.mxu1 %v416_v35 }
  0x4b   :  { %389 = vmatprep.subr.bf16.mxu0 %v388_v32 }
  0x4d   :  { %419 = vmatpush3.bf16.msra.mxu1 %v416_v35 }
  0x4e   :  { %391 = vmatpush3.bf16.msra.mxu0 %v388_v32  ;;  %421 = vmatprep.subr.bf16.mxu1 %v420_v41 }
  0x4f   :  { %393 = vmatprep.subr.bf16.mxu0 %v392_v38 }
  0x51   :  { %423 = vmatpush3.bf16.msra.mxu1 %v420_v41 }
  0x52   :  { %395 = vmatpush3.bf16.msra.mxu0 %v392_v38  ;;  %425 = vmatprep.subr.bf16.mxu1 %v424_v45 }
  0x53   :  { %397 = vmatprep.subr.bf16.mxu0 %v396_v44 }
  0x55   :  { %427 = vmatpush3.bf16.msra.mxu1 %v424_v45 }
  0x56   :  { %399 = vmatpush3.bf16.msra.mxu0 %v396_v44  ;;  %429 = vmatprep.subr.bf16.mxu1 %v428_v49 }
  0x59   :  { %331 = vmatmul.mubr.f32.vlgmr.msra.gmra.mrb[0].mxu0 %v57_v46  ;;  %431 = vmatpush3.bf16.msra.mxu1 %v428_v49 }
 0x12c   :  { %v332_v50 = vpop.f32.mrb[0].mxu0 }
 0x12d   :  { %v140_v51 = vpop.f32.mrb[1].mxu0  ;;  %v150_v53 = vmax.f32 %v332_v50, 0.0 }
 0x12e   :  { %v149_v52 = vmax.f32 %v140_v51, 0.0 }
 0x130   :  { %365 = vmatprep.mubr.f32.mxu1 %v149_v52 }
 0x131   :  { %366 = vmatmul.mubr.f32.vlgmr.msra.gmra.mrb[0].mxu1 %v150_v53 }
 0x204   :  { %v367_v54 = vpop.f32.mrb[0].mxu1 }
 0x205   :  { %243 = vst [vmem:[#allocation9 + $0x8] sm:$0xff] %v367_v54  ;;  %v233_v55 = vpop.f32.mrb[1].mxu1 }
 0x206   :  { %242 = vst [vmem:[#allocation9] sm:$0xff] %v233_v55 }
 0x207   :  { %515 = shalt.err (!%p512_p0)
}
 0x208   :  { %s516_s27 = scalar_lea.hbm %s628_s3, 256 }
 0x209   :  { %p517_p1 = scmp.ne.s32.totalorder %s628_s3, %s516_s27  ;;  %p520_p2 = scmp.lt.u32.totalorder %s516_s27, %s628_s3 }
 0x20b   :  { %p522_p3 = pnand %p520_p2, %p517_p1 }
 0x20d   :  { %525 = shalt.err (!%p522_p3)
}
 0x20e   :  { %255 = dma.vmem_to_hbm [thread:$0]  %s250_s21, 256, %s628_s3, [#allocation5], %s534_s24, %s534_s24, %s535_s25  }
 0x20f   :  { %530 = dma.done.wait [#allocation5], 256  }
 0x210   :  { %531 = vsyncadd [#allocation5], 4294967040 }
 0x211   :  { %259 = vsyncpa [#allocation4], 1 }
 0x212   :  { %260 = vsyncpa [#allocation7], 1 }
 0x213   :  { %261 = vsyncpa [#allocation5], 1 }

</bundles_post_ra>
